<compile_context>
chip_gen: v7x
topology: tpu7x:2x2x1
jax: 0.10.0
libtpu: 0.0.40
codegen_flags: <defaults>
</compile_context>

<pallas_src>
import functools

import jax
import jax.numpy as jnp
from jax import lax
from jax.experimental import pallas as pl
from jax.experimental.pallas import tpu as pltpu


def _round_up(x, m):
    return ((x + m - 1) // m) * m


def _cdiv(a, b):
    return (a + b - 1) // b


def _value_mlp_kernel(n_relu_layers, compute_dtype, x_ref, *refs):
    """Fused value-MLP on one batch tile resident in VMEM.

    refs = (w_0, ..., w_{n_relu_layers-1}, w_last_row, b_pack, o_ref)
      w_l        : (d_in_l, hidden)      compute_dtype
      w_last_row : (1, hidden)           compute_dtype  (last layer, transposed)
      b_pack     : (n_layers, hidden)    float32        (row l = bias of layer l;
                                                          last row holds the scalar
                                                          output bias at column 0)
      o_ref      : (1, block_b)          float32        lane-dense output slab
    """
    o_ref = refs[-1]
    b_pack_ref = refs[-2]
    w_last_ref = refs[-3]
    w_refs = refs[:-3]

    h = x_ref[...]  # (bb, d_in) in the streaming dtype (bf16 or f32)
    for l in range(n_relu_layers):
        w = w_refs[l][...]                      # (d_in_l, hidden)
        b = b_pack_ref[l:l + 1, :]              # (1, hidden) f32, static slice
        h = jnp.dot(h.astype(compute_dtype), w,
                    preferred_element_type=jnp.float32)
        # Bias-add + ReLU kept in f32 (portable to v5e, which has no bf16 VPU).
        h = jnp.maximum(h + b, 0.0)

    # Final (hidden -> 1) layer folded into the lane-dense output: contract
    # (1, hidden) with (bb, hidden) over the hidden (lane) dim -- the same
    # dimension-number pattern as q @ k^T -- yielding (1, bb) directly.  This
    # avoids both a pathological N=1 MXU shape and masked (bb, 1) stores.
    w_row = w_last_ref[...]                                     # (1, hidden)
    b_last = b_pack_ref[n_relu_layers:n_relu_layers + 1, 0:1]   # (1, 1) f32
    v_row = lax.dot_general(
        w_row, h.astype(compute_dtype),
        dimension_numbers=(((1,), (1,)), ((), ())),
        preferred_element_type=jnp.float32)                     # (1, bb)
    o_ref[...] = (v_row + b_last).astype(o_ref.dtype)


def value_forward(emb, weights, biases, *, block_b=1024, use_bf16=True):
    """Pallas forward pass of ValueFunction.value_net on already-embedded obs.

    emb:     (B, d_latent)
    weights: list of (d_in, d_out)  (d_out == hidden for all but last, last is (hidden, 1))
    biases:  list of (1, d_out)
    returns: (B, 1) float32

    use_bf16=True streams the embedding in bf16 and runs the MXU in bf16 with
    f32 accumulation (fast path on v5e/v6e/v7x).  use_bf16=False is exact f32.
    """
    B, d_in = emb.shape
    L = len(weights)
    assert L >= 2, "expect at least one hidden layer + output layer"
    hidden = weights[0].shape[1]
    assert weights[-1].shape == (hidden, 1)

    compute_dtype = jnp.bfloat16 if use_bf16 else jnp.float32

    # Stream the embedding in the compute dtype (no f32 up-cast, no HBM pad).
    if emb.dtype != compute_dtype:
        emb = emb.astype(compute_dtype)

    # Batch tile: multiple of 128 (lane-dense output), capped at block_b.
    # Choose bb ~= cdiv(B, 2) so the grid has >= 2 tiles whenever B > 128 and
    # both v7x TensorCores get work under dimension_semantics=("parallel",).
    block_b = max(128, _round_up(block_b, 128))
    bb = min(block_b, max(128, _round_up(_cdiv(B, 2), 128)))
    num_tiles = _cdiv(B, bb)

    hidden_ws = [w.astype(compute_dtype) for w in weights[:-1]]   # (d_in_l, hidden)
    w_last_row = weights[-1].T.astype(compute_dtype)              # (1, hidden)

    # Consolidate all biases into a single (L, hidden) f32 operand.
    b_rows = [b.reshape(-1).astype(jnp.float32) for b in biases[:-1]]
    b_last_row = jnp.zeros((hidden,), jnp.float32).at[0].set(
        biases[-1].reshape(-1)[0].astype(jnp.float32))
    b_pack = jnp.stack(b_rows + [b_last_row], axis=0)             # (L, hidden)

    # Input block: last dim equals the full feature dim (legal even if < 128);
    # partial boundary block on the batch dim is handled by Pallas (garbage
    # rows only reach output columns >= B, which are masked / sliced off).
    in_specs = [pl.BlockSpec((bb, d_in), lambda i: (i, 0))]
    args = [emb]
    for w in hidden_ws:
        # Grid-invariant weights.  For very large hidden sizes, add
        # pipeline_mode=pl.Buffered(1) here to single-buffer them and save VMEM.
        in_specs.append(pl.BlockSpec(w.shape, lambda i: (0, 0)))
        args.append(w)
    in_specs.append(pl.BlockSpec((1, hidden), lambda i: (0, 0)))
    args.append(w_last_row)
    in_specs.append(pl.BlockSpec((L, hidden), lambda i: (0, 0)))
    args.append(b_pack)

    # Lane-dense output slab: (1, B), block (1, bb); unmasked 128-wide stores
    # except on the boundary tile.
    out_spec = pl.BlockSpec((1, bb), lambda i: (0, i))
    out_shape = jax.ShapeDtypeStruct((1, B), jnp.float32)

    dims = [d_in] + [hidden] * (L - 1) + [1]
    flops = 2 * B * sum(dims[i] * dims[i + 1] for i in range(L))
    bytes_accessed = (int(emb.size) * emb.dtype.itemsize
                      + sum(int(a.size) * a.dtype.itemsize for a in args[1:])
                      + B * 4)
    cost = pl.CostEstimate(flops=flops, transcendentals=0,
                           bytes_accessed=bytes_accessed)

    # VMEM budget sized from the actual buffers (double-buffered input/output,
    # weights, activation temporaries), capped at 64 MiB so it fits v7x.
    in_itemsize = 2 if use_bf16 else 4
    w_bytes = sum(int(a.size) * a.dtype.itemsize for a in args[1:])
    tile_bytes = (2 * bb * d_in * in_itemsize
                  + 2 * bb * 4
                  + 2 * w_bytes
                  + 6 * bb * hidden * 4)
    vmem_limit = int(min(64 << 20, max(32 << 20, 2 * tile_bytes)))

    kernel = functools.partial(_value_mlp_kernel, L - 1, compute_dtype)
    out = pl.pallas_call(
        kernel,
        out_shape=out_shape,
        grid_spec=pltpu.PrefetchScalarGridSpec(
            num_scalar_prefetch=0,
            grid=(num_tiles,),
            in_specs=in_specs,
            out_specs=out_spec,
        ),
        compiler_params=pltpu.CompilerParams(
            dimension_semantics=("parallel",),
            vmem_limit_bytes=vmem_limit),
        cost_estimate=cost,
    )(*args)

    return out.reshape(B, 1)


def init_value_net_params(key, d_latent, d_out, n_hidden, hidden_size):
    """Deterministic init mimicking torch.nn.Linear default (uniform +-1/sqrt(fan_in))."""
    dims = [d_latent] + [hidden_size] * n_hidden + [d_out]
    weights, biases = [], []
    for i in range(len(dims) - 1):
        fan_in, fan_out = dims[i], dims[i + 1]
        key, kw, kb = jax.random.split(key, 3)
        bound = 1.0 / jnp.sqrt(jnp.float32(fan_in))
        w = jax.random.uniform(kw, (fan_in, fan_out), jnp.float32, -bound, bound)
        b = jax.random.uniform(kb, (1, fan_out), jnp.float32, -bound, bound)
        weights.append(w)
        biases.append(b)
    return weights, biases


def value_forward_ref(emb, weights, biases):
    """Pure-JAX reference of GenericNet forward."""
    h = emb.astype(jnp.float32)
    n = len(weights)
    for l, (w, b) in enumerate(zip(weights, biases)):
        h = h @ w + b
        if l < n - 1:
            h = jnp.maximum(h, 0.0)
    return h


if __name__ == "__main__":
    # params dict equivalents (small, synthetic)
    d_latent = 32          # params['d_latent']
    val_n_hidden = 3       # params['val_n_hidden']
    val_hidden_size = 128  # params['val_hidden_size']

    key = jax.random.PRNGKey(0)
    key, k_emb = jax.random.split(key)
    weights, biases = init_value_net_params(
        key, d_latent, 1, val_n_hidden, val_hidden_size)

    # Case 1: exact f32 path, batch not a multiple of 128 (2 tiles, partial
    # boundary block on both input and output).
    batch = 200
    emb = jax.random.normal(k_emb, (batch, d_latent), jnp.float32)
    ref = value_forward_ref(emb, weights, biases)
    val = jax.block_until_ready(
        value_forward(emb, weights, biases, block_b=1024, use_bf16=False))
    assert val.shape == (batch, 1), val.shape
    assert jnp.allclose(val, ref, atol=1e-4, rtol=1e-4), \
        float(jnp.max(jnp.abs(val - ref)))

    # Case 2: multi-tile grid (3 tiles) with a small forced tile size.
    batch2 = 300
    emb2 = jax.random.normal(jax.random.PRNGKey(1), (batch2, d_latent), jnp.float32)
    ref2 = value_forward_ref(emb2, weights, biases)
    val2 = jax.block_until_ready(
        value_forward(emb2, weights, biases, block_b=128, use_bf16=False))
    assert val2.shape == (batch2, 1), val2.shape
    assert jnp.allclose(val2, ref2, atol=1e-4, rtol=1e-4), \
        float(jnp.max(jnp.abs(val2 - ref2)))

    # Case 3: tiny batch (single partial tile on both dims), exact f32.
    batch3 = 5
    emb3 = jax.random.normal(jax.random.PRNGKey(2), (batch3, d_latent), jnp.float32)
    ref3 = value_forward_ref(emb3, weights, biases)
    val3 = jax.block_until_ready(
        value_forward(emb3, weights, biases, use_bf16=False))
    assert val3.shape == (batch3, 1), val3.shape
    assert jnp.allclose(val3, ref3, atol=1e-4, rtol=1e-4), \
        float(jnp.max(jnp.abs(val3 - ref3)))

    # Case 4: default bf16 fast path (bf16 input streaming + bf16 MXU, f32
    # accumulation).  Loose tolerance -- smoke test for the low-precision path.
    val4 = jax.block_until_ready(value_forward(emb, weights, biases))
    err = float(jnp.max(jnp.abs(val4 - ref)))
    assert val4.shape == (batch, 1), val4.shape
    assert err < 1e-1, err

    print("KERNEL_OK")
</pallas_src>

<mosaic_0001>
module attributes {stable_mosaic.version = 11 : i64} {
  func.func @_value_mlp_kernel(%arg0: i32, %arg1: memref<128x32xf32, #tpu.memory_space<vmem>>, %arg2: memref<32x128xf32, #tpu.memory_space<vmem>>, %arg3: memref<128x128xf32, #tpu.memory_space<vmem>>, %arg4: memref<128x128xf32, #tpu.memory_space<vmem>>, %arg5: memref<1x128xf32, #tpu.memory_space<vmem>>, %arg6: memref<4x128xf32, #tpu.memory_space<vmem>>, %arg7: memref<1x128xf32, #tpu.memory_space<vmem>>) attributes {dimension_semantics = [#tpu.dimension_semantics<parallel>], iteration_bounds = array<i64: 2>, scalar_prefetch = 0 : i64, scratch_operands = 0 : i64, tpu.core_type = #tpu.core_type<tc>, window_params = [{transform_indices = @transform_0, window_bounds = array<i64: 128, 32>}, {pipeline_mode = #tpu.pipeline_mode<synchronous>, transform_indices = @transform_1, window_bounds = array<i64: 32, 128>}, {pipeline_mode = #tpu.pipeline_mode<synchronous>, transform_indices = @transform_2, window_bounds = array<i64: 128, 128>}, {pipeline_mode = #tpu.pipeline_mode<synchronous>, transform_indices = @transform_3, window_bounds = array<i64: 128, 128>}, {pipeline_mode = #tpu.pipeline_mode<synchronous>, transform_indices = @transform_4, window_bounds = array<i64: 1, 128>}, {pipeline_mode = #tpu.pipeline_mode<synchronous>, transform_indices = @transform_5, window_bounds = array<i64: 4, 128>}, {transform_indices = @transform_6, window_bounds = array<i64: 1, 128>}]} {
    %c0 = arith.constant 0 : index
    %c0_0 = arith.constant 0 : index
    %0 = vector.load %arg1[%c0, %c0_0] : memref<128x32xf32, #tpu.memory_space<vmem>>, vector<128x32xf32>
    %c0_1 = arith.constant 0 : index
    %c0_2 = arith.constant 0 : index
    %1 = vector.load %arg2[%c0_1, %c0_2] : memref<32x128xf32, #tpu.memory_space<vmem>>, vector<32x128xf32>
    %c0_3 = arith.constant 0 : index
    %c0_4 = arith.constant 0 : index
    %2 = vector.load %arg6[%c0_3, %c0_4] : memref<4x128xf32, #tpu.memory_space<vmem>>, vector<1x128xf32>
    %cst = arith.constant dense<0.000000e+00> : vector<128x128xf32>
    %3 = tpu.matmul %0, %1, %cst {dimension_numbers = #tpu.dot_dimension_numbers<[1], [0], [0], [1], [0, 0, 1, 1], [], []>} : vector<128x32xf32>, vector<32x128xf32>, vector<128x128xf32> -> vector<128x128xf32>
    %4 = vector.broadcast %2 : vector<1x128xf32> to vector<128x128xf32>
    %5 = arith.addf %3, %4 : vector<128x128xf32>
    %cst_5 = arith.constant 0.000000e+00 : f32
    %6 = vector.broadcast %cst_5 : f32 to vector<128x128xf32>
    %7 = arith.maximumf %5, %6 : vector<128x128xf32>
    %c0_6 = arith.constant 0 : index
    %c0_7 = arith.constant 0 : index
    %8 = vector.load %arg3[%c0_6, %c0_7] : memref<128x128xf32, #tpu.memory_space<vmem>>, vector<128x128xf32>
    %c1 = arith.constant 1 : index
    %c0_8 = arith.constant 0 : index
    %9 = vector.load %arg6[%c1, %c0_8] : memref<4x128xf32, #tpu.memory_space<vmem>>, vector<1x128xf32>
    %cst_9 = arith.constant dense<0.000000e+00> : vector<128x128xf32>
    %10 = tpu.matmul %7, %8, %cst_9 {dimension_numbers = #tpu.dot_dimension_numbers<[1], [0], [0], [1], [0, 0, 1, 1], [], []>} : vector<128x128xf32>, vector<128x128xf32>, vector<128x128xf32> -> vector<128x128xf32>
    %11 = vector.broadcast %9 : vector<1x128xf32> to vector<128x128xf32>
    %12 = arith.addf %10, %11 : vector<128x128xf32>
    %cst_10 = arith.constant 0.000000e+00 : f32
    %13 = vector.broadcast %cst_10 : f32 to vector<128x128xf32>
    %14 = arith.maximumf %12, %13 : vector<128x128xf32>
    %c0_11 = arith.constant 0 : index
    %c0_12 = arith.constant 0 : index
    %15 = vector.load %arg4[%c0_11, %c0_12] : memref<128x128xf32, #tpu.memory_space<vmem>>, vector<128x128xf32>
    %c2 = arith.constant 2 : index
    %c0_13 = arith.constant 0 : index
    %16 = vector.load %arg6[%c2, %c0_13] : memref<4x128xf32, #tpu.memory_space<vmem>>, vector<1x128xf32>
    %cst_14 = arith.constant dense<0.000000e+00> : vector<128x128xf32>
    %17 = tpu.matmul %14, %15, %cst_14 {dimension_numbers = #tpu.dot_dimension_numbers<[1], [0], [0], [1], [0, 0, 1, 1], [], []>} : vector<128x128xf32>, vector<128x128xf32>, vector<128x128xf32> -> vector<128x128xf32>
    %18 = vector.broadcast %16 : vector<1x128xf32> to vector<128x128xf32>
    %19 = arith.addf %17, %18 : vector<128x128xf32>
    %cst_15 = arith.constant 0.000000e+00 : f32
    %20 = vector.broadcast %cst_15 : f32 to vector<128x128xf32>
    %21 = arith.maximumf %19, %20 : vector<128x128xf32>
    %c0_16 = arith.constant 0 : index
    %c0_17 = arith.constant 0 : index
    %22 = vector.load %arg5[%c0_16, %c0_17] : memref<1x128xf32, #tpu.memory_space<vmem>>, vector<1x128xf32>
    %c3 = arith.constant 3 : index
    %c0_18 = arith.constant 0 : index
    %23 = vector.load %arg6[%c3, %c0_18] : memref<4x128xf32, #tpu.memory_space<vmem>>, vector<1x1xf32>
    %cst_19 = arith.constant dense<0.000000e+00> : vector<1x128xf32>
    %24 = tpu.matmul %22, %21, %cst_19 {dimension_numbers = #tpu.dot_dimension_numbers<[1], [1], [0], [0], [0, 0, 1, 0], [], []>} : vector<1x128xf32>, vector<128x128xf32>, vector<1x128xf32> -> vector<1x128xf32>
    %25 = vector.broadcast %23 : vector<1x1xf32> to vector<1x128xf32>
    %26 = arith.addf %24, %25 : vector<1x128xf32>
    %c0_20 = arith.constant 0 : index
    %c0_21 = arith.constant 0 : index
    %27 = vector.load %arg7[%c0_20, %c0_21] : memref<1x128xf32, #tpu.memory_space<vmem>>, vector<1x128xf32>
    tpu.vector_store %arg7[%c0_20, %c0_21], %26 {strides = array<i32>} : memref<1x128xf32, #tpu.memory_space<vmem>>, vector<1x128xf32>,
    return
  }
  func.func @transform_0(%arg0: i32) -> (i32, i32) {
    %c0_i32 = arith.constant 0 : i32
    %c0_i32_0 = arith.constant 0 : i32
    return %arg0, %c0_i32 : i32, i32
  }
  func.func @transform_1(%arg0: i32) -> (i32, i32) {
    %c0_i32 = arith.constant 0 : i32
    %c0_i32_0 = arith.constant 0 : i32
    %c0_i32_1 = arith.constant 0 : i32
    return %c0_i32, %c0_i32_0 : i32, i32
  }
  func.func @transform_2(%arg0: i32) -> (i32, i32) {
    %c0_i32 = arith.constant 0 : i32
    %c0_i32_0 = arith.constant 0 : i32
    %c0_i32_1 = arith.constant 0 : i32
    return %c0_i32, %c0_i32_0 : i32, i32
  }
  func.func @transform_3(%arg0: i32) -> (i32, i32) {
    %c0_i32 = arith.constant 0 : i32
    %c0_i32_0 = arith.constant 0 : i32
    %c0_i32_1 = arith.constant 0 : i32
    return %c0_i32, %c0_i32_0 : i32, i32
  }
  func.func @transform_4(%arg0: i32) -> (i32, i32) {
    %c0_i32 = arith.constant 0 : i32
    %c0_i32_0 = arith.constant 0 : i32
    %c0_i32_1 = arith.constant 0 : i32
    return %c0_i32, %c0_i32_0 : i32, i32
  }
  func.func @transform_5(%arg0: i32) -> (i32, i32) {
    %c0_i32 = arith.constant 0 : i32
    %c0_i32_0 = arith.constant 0 : i32
    %c0_i32_1 = arith.constant 0 : i32
    return %c0_i32, %c0_i32_0 : i32, i32
  }
  func.func @transform_6(%arg0: i32) -> (i32, i32) {
    %c0_i32 = arith.constant 0 : i32
    %c0_i32_0 = arith.constant 0 : i32
    return %c0_i32, %arg0 : i32, i32
  }
}

</mosaic_0001>

<bundles_post_ra>
// kernel: tpu_custom_call.1
= control target key start
LH: loop header
LB: loop body
LE: loop exit
PB: predicated region body
PF: predicated region fallthrough
CT: control target
= control target key end

     0   :  { %11 = vsyncpa [#allocation3], 0  ;;  %s1936_s0 = inlined_call_operand.vmem [shape: f32[200,32], index: 0, kind: input, shape index: {}]   ;;  %s1937_s1 = inlined_call_operand.hbm [shape: f32[32,128], index: 1, kind: input, shape index: {}]   ;;  %s1938_s2 = inlined_call_operand.vmem [shape: f32[128,128], index: 2, kind: input, shape index: {}]   ;;  %s1939_s3 = inlined_call_operand.vmem [shape: f32[128,128], index: 3, kind: input, shape index: {}]   ;;  %s1940_s4 = inlined_call_operand.vmem [shape: f32[1,128], index: 4, kind: input, shape index: {}]   ;;  %s1941_s5 = inlined_call_operand.vmem [shape: f32[4,128], index: 5, kind: input, shape index: {}]   ;;  %s1942_s6 = inlined_call_operand.hbm [shape: f32[1,200], index: 6, kind: output, shape index: {}]  }
   0x1   :  { %12 = vsyncpa [#allocation4], 0 }
   0x2   :  { %14 = vsyncpa [#allocation4 + $0x1], 0  ;;  %s1645_s21 = smov 0   ;;  %s1647_s22 = smov 0  }
   0x3   :  { %s1649_s23 = smov 0   ;;  %s1651_s24 = smov 0  }
   0x4 LB: > { %s1666_s25 = sadd.s32 4294967295, %s1600_s24   ;;  %s1043_s26 = sadd.s32 4294967294, %s1600_s24   ;;  %s1600_s24 = sphi %s1651_s24, %s1958_s24   ;;  %s1596_s23 = sphi %s1649_s23, %s1957_s23   ;;  %s1592_s22 = sphi %s1647_s22, %s1956_s22   ;;  %s1588_s21 = sphi %s1645_s21, %s1955_s21  }
   0x5   : > { %s1670_s27 = sadd.s32 1, %s1600_s24   ;;  %s158_s28 = sadd.s32 1, %s1596_s23 }
   0x6   : > { %s155_s29 = ssub.s32 %s1600_s24, %s1670_s27  ;;  %p168_p0 = scmp.ne.s32.totalorder %s1596_s23, %s1592_s22 }
   0x7   : > { %p156_p1 = scmp.eq.s32.totalorder %s155_s29, 0  ;;  %p169_p2 = scmp.eq.s32.totalorder %s1666_s25, 1 }
   0x8   : > { %p174_p3 = scmp.ne.s32.totalorder %s1592_s22, %s1588_s21  ;;  %p175_p4 = scmp.eq.s32.totalorder %s1043_s26, 1 }
   0x9   : > { %s1681_s30 = scalar_select %p156_p1, %s1596_s23, %s158_s28  }
   0xa   : > { %p1683_p5 = por %p169_p2, %p168_p0  ;;  %p1687_p6 = por %p175_p4, %p174_p3 }
   0xb   : > { %p1044_p7 = scmp.ge.s32.totalorder %s1600_s24, 1  ;;  %p182_p8 = scmp.lt.s32.totalorder %s1600_s24, 3 }
   0xc   : > { %s1946_s7 = scalar_select %p1683_p5, 1, 0 }
   0xd   : > { %s1947_s8 = scalar_select %p1687_p6, 1, 0 }
   0xe   : > { %p1943_p9 = scmp.eq.s32.totalorder %s1666_s25, 0  ;;  %p1694_p10 = pnand %p1044_p7, %p182_p8 }
   0xf   : > { %s1602_s10 = smov [#allocation2]   ;;  %s1506_s15 = scalar_lea.hbm %s1937_s1, 512 }
  0x10   : > { %s1948_s9 = scalar_select %p1694_p10, 1, 0 }
  0x11   : > { %s194_s11 = sshll.u32 %s1602_s10, 4  ;;  %p1455_p11 = pneg %p1694_p10  ;;  %s195_s11 = int_to_ptr.vmem [resolvable:$true] %s194_s11 }
  0x12   : > { %p1507_p13 = scmp.ne.s32.totalorder %s1937_s1, %s1506_s15  ;;  %p1513_p3 = scmp.lt.u32.totalorder %s1506_s15, %s1937_s1 }
  0x13   : > { %p1702_p12 = pnand %p1943_p9, %p1455_p11 }
  0x15   : > { %p1508_p0 = pneg %p1702_p12 }
  0x17   : > { %p1509_p1 = pnand %p1508_p0, %p1507_p13 }
  0x19   : > { %p1510_p2 = pneg %p1509_p1 }
  0x1b   : > { %p1515_p4 = pnand %p1513_p3, %p1510_p2 }
  0x1d   : > { %1518 = shalt.err (!%p1515_p4)
}
  0x1e   : > { %s1519_s20 = scalar_lea.vmem %s195_s11, 512  ;;  %p1527_p9 = scmp.lt.s32.totalorder %s195_s11, %s195_s11 }
  0x1f   : > { %p1520_p7 = scmp.ne.s32.totalorder %s195_s11, %s1519_s20  ;;  %p1528_p6 = scmp.lt.s32.totalorder %s1519_s20, %s1519_s20 }
  0x21   : > { %p1522_p8 = pnand %p1520_p7, %p1508_p0  ;;  %p1529_p5 = por %p1528_p6, %p1527_p9 }
  0x23   : > { %p1523_p11 = pneg %p1522_p8 }
  0x25   : > { %p1530_p10 = pnand %p1529_p5, %p1523_p11 }
  0x27   : > { %1533 = shalt.err (!%p1530_p10)
}
  0x28   : > { %s1603_s26 = smov 128   ;;  %s1604_s28 = smov 8  }
  0x29   : > { %1458 = dma.hbm_to_vmem [thread:$0]  (!%p1702_p12), %s1937_s1, 512, %s195_s11, [#allocation3], %s1603_s26, %s1603_s26, %s1604_s28  }
  0x2a   : > { %p1950_p13 = scmp.ne.s32.totalorder %s1948_s9, 0 }
  0x2b   : > { %p1951_p1 = scmp.eq.s32.totalorder (!%p1950_p13), %s1666_s25, 0 }
  0x2c   : > { %239 = sbr.rel (%p1950_p13) target bundleno = 1009 (0x3f1), region = 44 }
  0x33   : > { %1579 = dma.done.wait (%p1951_p1), [#allocation3], 512   ;;  %p1952_p0 = pmov %p1951_p1 }
  0x34   : > { %s1729_s13 = sshll.u32 %s1666_s25, 4  ;;  %vm311_vm0 = vcmask 261120   ;;  %v302_v0 = vld [vmem:[#allocation2] sm:$0xff]  ;;  %v303_v1 = vld [vmem:[#allocation2 + $0x8] sm:$0xff]  ;;  %v304_v2 = vld [vmem:[#allocation2 + $0x10] sm:$0xff]  ;;  %vm1606_vm1 = vmmov 0  }
  0x35   : > { %1581 = vsyncadd (%p1952_p0), [#allocation3], 4294966784  ;;  %p277_p5 = scmp.lt.s32.totalorder %s1729_s13, 24  ;;  %v1353_v3 = vpack.c.bf16 %v303_v1, %v302_v0  ;;  %v305_v4 = vld [vmem:[#allocation2 + $0x18] sm:$0xff]  ;;  %v521_v7 = vld [vmem:[%s1938_s2] sm:$0xff]  ;;  %s270_s9 = sand.u32 1, %s1592_s22  }
  0x36   : > { %v1357_v6 = vpack.c.bf16 %v305_v4, %v304_v2  ;;  %v522_v8 = vld [vmem:[%s1938_s2 + $0x8] sm:$0xff]  ;;  %v523_v9 = vld [vmem:[%s1938_s2 + $0x10] sm:$0xff]  ;;  %v524_v10 = vld [vmem:[%s1938_s2 + $0x18] sm:$0xff]  ;;  %s271_s17 = scalar_lea.vmem [#allocation5], %s270_s9  ;;  %s1894_s26 = scalar_lea.hbm %s1942_s6, %s1729_s13 }
  0x37   : > { %s278_s12 = scalar_select %p277_p5, %s1729_s13, 24  ;;  %1354 = vmatprep.subr.bf16.mxu0 %v1353_v3  ;;  %v1361_v12 = vpack.c.bf16 %v522_v8, %v521_v7  ;;  %v1365_v13 = vpack.c.bf16 %v524_v10, %v523_v9  ;;  %v525_v15 = vld [vmem:[%s1938_s2 + $0x20] sm:$0xff]  ;;  %v526_v16 = vld [vmem:[%s1938_s2 + $0x28] sm:$0xff]  ;;  %v527_v20 = vld [vmem:[%s1938_s2 + $0x30] sm:$0xff] }
  0x38   : > { %1356 = vmatpush3.bf16.msra.mxu0 %v1353_v3  ;;  %v1369_v18 = vpack.c.bf16 %v526_v16, %v525_v15  ;;  %v528_v21 = vld [vmem:[%s1938_s2 + $0x38] sm:$0xff]  ;;  %v529_v25 = vld [vmem:[%s1938_s2 + $0x40] sm:$0xff]  ;;  %v530_v26 = vld [vmem:[%s1938_s2 + $0x48] sm:$0xff]  ;;  %s976_s18 = sshll.u32 %s271_s17, 4  ;;  %s964_s28 = scalar_lea.sflag [#allocation4], %s270_s9  ;;  %s1896_s18 = int_to_ptr.vmem [resolvable:$true] %s976_s18 }
  0x39   : > { %s1050_s14 = sshll.u32 %s278_s12, 3  ;;  %1358 = vmatprep.subr.bf16.mxu0 %v1357_v6  ;;  %1362 = vmatprep.subr.bf16.mxu1 %v1361_v12  ;;  %v1373_v23 = vpack.c.bf16 %v528_v21, %v527_v20  ;;  %v1377_v28 = vpack.c.bf16 %v530_v26, %v529_v25  ;;  %v531_v30 = vld [vmem:[%s1938_s2 + $0x50] sm:$0xff]  ;;  %v532_v31 = vld [vmem:[%s1938_s2 + $0x58] sm:$0xff]  ;;  %v533_v35 = vld [vmem:[%s1938_s2 + $0x60] sm:$0xff]  ;;  %p1953_p9 = scmp.ne.s32.totalorder %s1946_s7, 0 }
  0x3a   : > { %s1736_s11 = scalar_lea.vmem %s1936_s0, %s1050_s14  ;;  %1364 = vmatpush3.bf16.msra.mxu1 %v1361_v12  ;;  %v1381_v33 = vpack.c.bf16 %v532_v31, %v531_v30  ;;  %v534_v36 = vld [vmem:[%s1938_s2 + $0x68] sm:$0xff]  ;;  %v535_v43 = vld [vmem:[%s1938_s2 + $0x70] sm:$0xff]  ;;  %v536_v44 = vld [vmem:[%s1938_s2 + $0x78] sm:$0xff]  ;;  %s1609_s29 = smov [#allocation5]  }
  0x3b   : > { %v286_v5 = vld [vmem:[%s1736_s11] sm:$0xff]  ;;  %v287_v11 = vld [vmem:[%s1736_s11 + $0x8] sm:$0xff]  ;;  %v288_v14 = vld [vmem:[%s1736_s11 + $0x10] sm:$0xff]  ;;  %1366 = vmatprep.subr.bf16.mxu1 %v1365_v13  ;;  %v1385_v38 = vpack.c.bf16 %v534_v36, %v533_v35  ;;  %v1389_v45 = vpack.c.bf16 %v536_v44, %v535_v43  ;;  %s1538_s10 = sshll.u32 %s1609_s29, 4  ;;  %s1539_s10 = int_to_ptr.vmem [resolvable:$false] %s1538_s10 }
  0x3c   : > { %1182 = vmatprep.mubr.msk.f32.mxu0 %vm311_vm0, %v286_v5  ;;  %1360 = vmatpush3.bf16.msra.mxu0 %v1357_v6  ;;  %v289_v17 = vld [vmem:[%s1736_s11 + $0x18] sm:$0xff]  ;;  %v290_v19 = vld [vmem:[%s1736_s11 + $0x20] sm:$0xff]  ;;  %v291_v22 = vld [vmem:[%s1736_s11 + $0x28] sm:$0xff]  ;;  %s1540_s12 = scalar_lea.vmem %s1539_s10, 32  ;;  %p1541_p2 = scmp.lt.s32.totalorder %s1896_s18, %s1539_s10 }
  0x3d   : > { %v292_v24 = vld [vmem:[%s1736_s11 + $0x30] sm:$0xff]  ;;  %v293_v27 = vld [vmem:[%s1736_s11 + $0x38] sm:$0xff]  ;;  %v294_v29 = vld [vmem:[%s1736_s11 + $0x40] sm:$0xff] }
  0x3e   : > { %1368 = vmatpush3.bf16.msra.mxu1 %v1365_v13  ;;  %v295_v32 = vld [vmem:[%s1736_s11 + $0x48] sm:$0xff]  ;;  %v296_v34 = vld [vmem:[%s1736_s11 + $0x50] sm:$0xff]  ;;  %v297_v37 = vld [vmem:[%s1736_s11 + $0x58] sm:$0xff] }
  0x3f   : > { %1183 = vmatmul.mubr.msk.f32.vlgmr.msra.gmra.mrb[0].mxu0 %vm311_vm0, %v287_v11  ;;  %1370 = vmatprep.subr.bf16.mxu1 %v1369_v18  ;;  %v298_v39 = vld [vmem:[%s1736_s11 + $0x60] sm:$0xff]  ;;  %v299_v40 = vld [vmem:[%s1736_s11 + $0x68] sm:$0xff]  ;;  %v300_v41 = vld [vmem:[%s1736_s11 + $0x70] sm:$0xff] }
  0x40   : > { %1185 = vmatprep.mubr.msk.f32.mxu0 %vm311_vm0, %v288_v14  ;;  %v301_v42 = vld [vmem:[%s1736_s11 + $0x78] sm:$0xff]  ;;  %v703_v46 = vld [vmem:[%s1939_s3] sm:$0xff]  ;;  %v704_v47 = vld [vmem:[%s1939_s3 + $0x8] sm:$0xff]  ;;  %s1534_s11 = scalar_lea.vmem %s1896_s18, 16 }
  0x41   : > { %v705_v48 = vld [vmem:[%s1939_s3 + $0x10] sm:$0xff]  ;;  %v1393_v49 = vpack.c.bf16 %v704_v47, %v703_v46  ;;  %v706_v50 = vld [vmem:[%s1939_s3 + $0x18] sm:$0xff]  ;;  %v707_v52 = vld [vmem:[%s1939_s3 + $0x20] sm:$0xff]  ;;  %p1535_p6 = scmp.ne.s32.totalorder %s1896_s18, %s1534_s11  ;;  %p1542_p3 = scmp.lt.s32.totalorder %s1540_s12, %s1534_s11 }
  0x42   : > { %1372 = vmatpush3.bf16.msra.mxu1 %v1369_v18  ;;  %v1397_v51 = vpack.c.bf16 %v706_v50, %v705_v48  ;;  %v708_v53 = vld [vmem:[%s1939_s3 + $0x28] sm:$0xff]  ;;  %v709_v55 = vld [vmem:[%s1939_s3 + $0x30] sm:$0xff]  ;;  %v710_v56 = vld [vmem:[%s1939_s3 + $0x38] sm:$0xff] }
  0x43   : > { %1186 = vmatmul.mubr.msk.f32.gmra.mrb[2].mxu0 %vm311_vm0, %v289_v17  ;;  %1374 = vmatprep.subr.bf16.mxu1 %v1373_v23  ;;  %v1401_v54 = vpack.c.bf16 %v708_v53, %v707_v52  ;;  %v1405_v57 = vpack.c.bf16 %v710_v56, %v709_v55  ;;  %v711_v58 = vld [vmem:[%s1939_s3 + $0x40] sm:$0xff]  ;;  %v712_v59 = vld [vmem:[%s1939_s3 + $0x48] sm:$0xff]  ;;  %v713_v61 = vld [vmem:[%s1939_s3 + $0x50] sm:$0xff]  ;;  %p1536_p10 = pnand %p1535_p6, %p1953_p9  ;;  %p1543_p4 = por %p1542_p3, %p1541_p2 }
  0x44   : > { %1188 = vmatprep.mubr.msk.f32.mxu0 %vm311_vm0, %v290_v19  ;;  %1394 = vmatprep.subr.bf16.mxu0 %v1393_v49  ;;  %v1409_v60 = vpack.c.bf16 %v712_v59, %v711_v58  ;;  %v714_v62 = vld [vmem:[%s1939_s3 + $0x58] sm:$0xff]  ;;  %v715_v0 = vld [vmem:[%s1939_s3 + $0x60] sm:$0xff]  ;;  %v716_v1 = vld [vmem:[%s1939_s3 + $0x68] sm:$0xff] }
  0x45   : > { %1396 = vmatpush3.bf16.msra.mxu0 %v1393_v49  ;;  %v1413_v63 = vpack.c.bf16 %v714_v62, %v713_v61  ;;  %v1417_v2 = vpack.c.bf16 %v716_v1, %v715_v0  ;;  %v1051_v3 = vld [vmem:[%s1941_s5] ss:$0 sm:$0xff]  ;;  %v717_v52 = vld [vmem:[%s1939_s3 + $0x70] sm:$0xff]  ;;  %v718_v53 = vld [vmem:[%s1939_s3 + $0x78] sm:$0xff]  ;;  %p1537_p12 = pneg %p1536_p10 }
  0x46   : > { %1376 = vmatpush3.bf16.msra.mxu1 %v1373_v23  ;;  %1398 = vmatprep.subr.bf16.mxu0 %v1397_v51  ;;  %v1068_v55 = vld [vmem:[%s1941_s5 + $0x1] ss:$0 sm:$0xff] }
  0x47   : > { %1189 = vmatmul.mubr.msk.f32.gmra.mrb[4].mxu0 %vm311_vm0, %v291_v22  ;;  %1378 = vmatprep.subr.bf16.mxu1 %v1377_v28  ;;  %p1544_p7 = pnand %p1543_p4, %p1537_p12 }
  0x48   : > { %1191 = vmatprep.mubr.msk.f32.mxu0 %vm311_vm0, %v292_v24 }
  0x49   : > { %1400 = vmatpush3.bf16.msra.mxu0 %v1397_v51 }
  0x4a   : > { %1380 = vmatpush3.bf16.msra.mxu1 %v1377_v28  ;;  %1402 = vmatprep.subr.bf16.mxu0 %v1401_v54 }
  0x4b   : > { %1192 = vmatmul.mubr.msk.f32.gmra.mrb[6].mxu0 %vm311_vm0, %v293_v27  ;;  %1382 = vmatprep.subr.bf16.mxu1 %v1381_v33 }
  0x4c   : > { %1194 = vmatprep.mubr.msk.f32.mxu0 %vm311_vm0, %v294_v29 }
  0x4d   : > { %1404 = vmatpush3.bf16.msra.mxu0 %v1401_v54  ;;  %v1421_v54 = vpack.c.bf16 %v718_v53, %v717_v52 }
  0x4e   : > { %1384 = vmatpush3.bf16.msra.mxu1 %v1381_v33  ;;  %1406 = vmatprep.subr.bf16.mxu0 %v1405_v57 }
  0x4f   : > { %1195 = vmatmul.mubr.msk.f32.gmra.mrb[8].mxu0 %vm311_vm0, %v295_v32  ;;  %1386 = vmatprep.subr.bf16.mxu1 %v1385_v38 }
  0x50   : > { %1197 = vmatprep.mubr.msk.f32.mxu0 %vm311_vm0, %v296_v34 }
  0x51   : > { %1408 = vmatpush3.bf16.msra.mxu0 %v1405_v57 }
  0x52   : > { %1388 = vmatpush3.bf16.msra.mxu1 %v1385_v38  ;;  %1410 = vmatprep.subr.bf16.mxu0 %v1409_v60 }
  0x53   : > { %1198 = vmatmul.mubr.msk.f32.gmra.mrb[10].mxu0 %vm311_vm0, %v297_v37  ;;  %1390 = vmatprep.subr.bf16.mxu1 %v1389_v45 }
  0x54   : > { %1200 = vmatprep.mubr.msk.f32.mxu0 %vm311_vm0, %v298_v39 }
  0x55   : > { %1412 = vmatpush3.bf16.msra.mxu0 %v1409_v60 }
  0x56   : > { %1392 = vmatpush3.bf16.msra.mxu1 %v1389_v45  ;;  %1414 = vmatprep.subr.bf16.mxu0 %v1413_v63 }
  0x57   : > { %1201 = vmatmul.mubr.msk.f32.gmra.mrb[12].mxu0 %vm311_vm0, %v299_v40 }
  0x58   : > { %1203 = vmatprep.mubr.msk.f32.mxu0 %vm311_vm0, %v300_v41 }
  0x59   : > { %1416 = vmatpush3.bf16.msra.mxu0 %v1413_v63 }
  0x5a   : > { %1418 = vmatprep.subr.bf16.mxu0 %v1417_v2 }
  0x5b   : > { %1204 = vmatmul.mubr.msk.f32.gmra.mrb[14].mxu0 %vm311_vm0, %v301_v42 }
  0x5d   : > { %1420 = vmatpush3.bf16.msra.mxu0 %v1417_v2 }
  0x5e   : > { %1422 = vmatprep.subr.bf16.mxu0 %v1421_v54 }
  0x61   : > { %1424 = vmatpush3.bf16.msra.mxu0 %v1421_v54 }
 0x112   : > { %v1184_v4 = vpop.f32.mrb[0].mxu0 }
 0x113   : > { %v432_v5 = vadd.f32 %v1184_v4, %v1051_v3  ;;  %v426_v6 = vpop.f32.mrb[1].mxu0 }
 0x114   : > { %v427_v7 = vadd.f32 %v1051_v3, %v426_v6 }
 0x115   : > { %v506_v10 = vmax.f32 %v432_v5, 0.0 }
 0x116   : > { %v1187_v8 = vpop.f32.mrb[2].mxu0  ;;  %v505_v9 = vmax.f32 %v427_v7, 0.0 }
 0x117   : > { %v442_v11 = vadd.f32 %v1187_v8, %v1051_v3  ;;  %v436_v12 = vpop.f32.mrb[3].mxu0 }
 0x118   : > { %v437_v13 = vadd.f32 %v1051_v3, %v436_v12  ;;  %1238 = vmatprep.mubr.f32.mxu1 %v505_v9 }
 0x119   : > { %v508_v14 = vmax.f32 %v442_v11, 0.0  ;;  %1239 = vmatmul.mubr.f32.vlgmr.msra.gmra.mrb[0].mxu1 %v506_v10 }
 0x11a   : > { %v507_v15 = vmax.f32 %v437_v13, 0.0  ;;  %v1190_v16 = vpop.f32.mrb[4].mxu0 }
 0x11b   : > { %v452_v17 = vadd.f32 %v1190_v16, %v1051_v3  ;;  %v446_v18 = vpop.f32.mrb[5].mxu0 }
 0x11c   : > { %1241 = vmatprep.mubr.f32.mxu1 %v507_v15  ;;  %v447_v19 = vadd.f32 %v1051_v3, %v446_v18 }
 0x11d   : > { %v510_v20 = vmax.f32 %v452_v17, 0.0  ;;  %1242 = vmatmul.mubr.f32.gmra.mrb[2].mxu1 %v508_v14 }
 0x11e   : > { %v509_v21 = vmax.f32 %v447_v19, 0.0  ;;  %v1193_v22 = vpop.f32.mrb[6].mxu0 }
 0x11f   : > { %v462_v23 = vadd.f32 %v1193_v22, %v1051_v3  ;;  %v456_v24 = vpop.f32.mrb[7].mxu0 }
 0x120   : > { %1244 = vmatprep.mubr.f32.mxu1 %v509_v21  ;;  %v457_v25 = vadd.f32 %v1051_v3, %v456_v24 }
 0x121   : > { %1245 = vmatmul.mubr.f32.gmra.mrb[4].mxu1 %v510_v20  ;;  %v512_v26 = vmax.f32 %v462_v23, 0.0 }
 0x122   : > { %v511_v27 = vmax.f32 %v457_v25, 0.0  ;;  %v1196_v28 = vpop.f32.mrb[8].mxu0 }
 0x123   : > { %v472_v29 = vadd.f32 %v1196_v28, %v1051_v3  ;;  %v466_v30 = vpop.f32.mrb[9].mxu0 }
 0x124   : > { %1247 = vmatprep.mubr.f32.mxu1 %v511_v27  ;;  %v467_v31 = vadd.f32 %v1051_v3, %v466_v30 }
 0x125   : > { %1248 = vmatmul.mubr.f32.gmra.mrb[6].mxu1 %v512_v26  ;;  %v514_v32 = vmax.f32 %v472_v29, 0.0 }
 0x126   : > { %v513_v33 = vmax.f32 %v467_v31, 0.0  ;;  %v1199_v34 = vpop.f32.mrb[10].mxu0 }
 0x127   : > { %v482_v35 = vadd.f32 %v1199_v34, %v1051_v3  ;;  %v476_v36 = vpop.f32.mrb[11].mxu0 }
 0x128   : > { %1250 = vmatprep.mubr.f32.mxu1 %v513_v33  ;;  %v477_v37 = vadd.f32 %v1051_v3, %v476_v36 }
 0x129   : > { %1251 = vmatmul.mubr.f32.gmra.mrb[8].mxu1 %v514_v32  ;;  %v516_v38 = vmax.f32 %v482_v35, 0.0 }
 0x12a   : > { %v515_v39 = vmax.f32 %v477_v37, 0.0  ;;  %v1202_v40 = vpop.f32.mrb[12].mxu0 }
 0x12b   : > { %v492_v41 = vadd.f32 %v1202_v40, %v1051_v3  ;;  %v486_v42 = vpop.f32.mrb[13].mxu0  ;;  %v1605_v40 = vmov 0.0|0.0  }
 0x12c   : > { %1253 = vmatprep.mubr.f32.mxu1 %v515_v39  ;;  %v487_v43 = vadd.f32 %v1051_v3, %v486_v42  ;;  %1425 = vmatprep.subr.bf16.mxu1 %v1605_v40  ;;  %v886_v42 = vld [vmem:[%s1941_s5 + $0x3] sm:$0x1] }
 0x12d   : > { %1254 = vmatmul.mubr.f32.gmra.mrb[10].mxu1 %v516_v38  ;;  %v518_v44 = vmax.f32 %v492_v41, 0.0  ;;  %v1607_v41 = vmov 0.0  }
 0x12e   : > { %v517_v45 = vmax.f32 %v487_v43, 0.0  ;;  %v1205_v46 = vpop.f32.mrb[14].mxu0  ;;  %v1608_v43 = vmov 0  }
 0x12f   : > { %v502_v47 = vadd.f32 %v1205_v46, %v1051_v3  ;;  %v496_v48 = vpop.f32.mrb[15].mxu0  ;;  %1505 = vset.pattern.permute.xlu0 %v1608_v43 }
 0x130   : > { %1256 = vmatprep.mubr.f32.mxu1 %v517_v45  ;;  %v497_v49 = vadd.f32 %v1051_v3, %v496_v48  ;;  %889 = vperm.xlu0 %1505, %v886_v42  }
 0x131   : > { %1257 = vmatmul.mubr.f32.gmra.mrb[12].mxu1 %v518_v44  ;;  %v520_v50 = vmax.f32 %v502_v47, 0.0  ;;  %v1069_v44 = vld [vmem:[%s1941_s5 + $0x2] ss:$0 sm:$0xff] }
 0x132   : > { %v519_v51 = vmax.f32 %v497_v49, 0.0 }
 0x134   : > { %1259 = vmatprep.mubr.f32.mxu1 %v519_v51 }
 0x135   : > { %1260 = vmatmul.mubr.f32.gmra.mrb[14].mxu1 %v520_v50 }
 0x136   : > { %1350 = vmatprep.mubr.msk.f32.mxu1 %vm1606_vm1, %v1607_v41 }
 0x1ec   : > { %v1240_v56 = vpop.f32.mrb[0].mxu1 }
 0x1ed   : > { %v614_v57 = vadd.f32 %v1240_v56, %v1068_v55  ;;  %v608_v58 = vpop.f32.mrb[1].mxu1 }
 0x1ee   : > { %v609_v59 = vadd.f32 %v1068_v55, %v608_v58 }
 0x1ef   : > { %v688_v62 = vmax.f32 %v614_v57, 0.0 }
 0x1f0   : > { %v687_v60 = vmax.f32 %v609_v59, 0.0  ;;  %v1243_v61 = vpop.f32.mrb[2].mxu1 }
 0x1f1   : > { %v624_v63 = vadd.f32 %v1243_v61, %v1068_v55  ;;  %v618_v0 = vpop.f32.mrb[3].mxu1 }
 0x1f2   : > { %v619_v1 = vadd.f32 %v1068_v55, %v618_v0  ;;  %1294 = vmatprep.mubr.f32.mxu0 %v687_v60 }
 0x1f3   : > { %v690_v2 = vmax.f32 %v624_v63, 0.0  ;;  %1295 = vmatmul.mubr.f32.vlgmr.msra.gmra.mrb[16].mxu0 %v688_v62 }
 0x1f4   : > { %v689_v3 = vmax.f32 %v619_v1, 0.0  ;;  %v1246_v4 = vpop.f32.mrb[4].mxu1 }
 0x1f5   : > { %v634_v5 = vadd.f32 %v1246_v4, %v1068_v55  ;;  %v628_v6 = vpop.f32.mrb[5].mxu1 }
 0x1f6   : > { %1297 = vmatprep.mubr.f32.mxu0 %v689_v3  ;;  %v629_v7 = vadd.f32 %v1068_v55, %v628_v6 }
 0x1f7   : > { %v692_v8 = vmax.f32 %v634_v5, 0.0  ;;  %1298 = vmatmul.mubr.f32.gmra.mrb[18].mxu0 %v690_v2 }
 0x1f8   : > { %v691_v9 = vmax.f32 %v629_v7, 0.0  ;;  %v1249_v10 = vpop.f32.mrb[6].mxu1 }
 0x1f9   : > { %v644_v11 = vadd.f32 %v1249_v10, %v1068_v55  ;;  %v638_v12 = vpop.f32.mrb[7].mxu1 }
 0x1fa   : > { %1300 = vmatprep.mubr.f32.mxu0 %v691_v9  ;;  %v639_v13 = vadd.f32 %v1068_v55, %v638_v12 }
 0x1fb   : > { %1301 = vmatmul.mubr.f32.gmra.mrb[20].mxu0 %v692_v8  ;;  %v694_v14 = vmax.f32 %v644_v11, 0.0 }
 0x1fc   : > { %v693_v15 = vmax.f32 %v639_v13, 0.0  ;;  %v1252_v16 = vpop.f32.mrb[8].mxu1 }
 0x1fd   : > { %v654_v17 = vadd.f32 %v1252_v16, %v1068_v55  ;;  %v648_v18 = vpop.f32.mrb[9].mxu1 }
 0x1fe   : > { %1303 = vmatprep.mubr.f32.mxu0 %v693_v15  ;;  %v649_v19 = vadd.f32 %v1068_v55, %v648_v18 }
 0x1ff   : > { %1304 = vmatmul.mubr.f32.gmra.mrb[22].mxu0 %v694_v14  ;;  %v696_v20 = vmax.f32 %v654_v17, 0.0 }
 0x200   : > { %v695_v21 = vmax.f32 %v649_v19, 0.0  ;;  %v1255_v22 = vpop.f32.mrb[10].mxu1 }
 0x201   : > { %v664_v23 = vadd.f32 %v1255_v22, %v1068_v55  ;;  %v658_v24 = vpop.f32.mrb[11].mxu1 }
 0x202   : > { %1306 = vmatprep.mubr.f32.mxu0 %v695_v21  ;;  %v659_v25 = vadd.f32 %v1068_v55, %v658_v24 }
 0x203   : > { %1307 = vmatmul.mubr.f32.gmra.mrb[24].mxu0 %v696_v20  ;;  %v698_v26 = vmax.f32 %v664_v23, 0.0 }
 0x204   : > { %v697_v27 = vmax.f32 %v659_v25, 0.0  ;;  %v1258_v28 = vpop.f32.mrb[12].mxu1 }
 0x205   : > { %v674_v29 = vadd.f32 %v1258_v28, %v1068_v55  ;;  %v668_v30 = vpop.f32.mrb[13].mxu1 }
 0x206   : > { %1309 = vmatprep.mubr.f32.mxu0 %v697_v27  ;;  %v669_v31 = vadd.f32 %v1068_v55, %v668_v30 }
 0x207   : > { %1310 = vmatmul.mubr.f32.gmra.mrb[26].mxu0 %v698_v26  ;;  %v700_v32 = vmax.f32 %v674_v29, 0.0 }
 0x208   : > { %v699_v33 = vmax.f32 %v669_v31, 0.0  ;;  %v1261_v34 = vpop.f32.mrb[14].mxu1 }
 0x209   : > { %v684_v35 = vadd.f32 %v1261_v34, %v1068_v55  ;;  %v678_v36 = vpop.f32.mrb[15].mxu1 }
 0x20a   : > { %1312 = vmatprep.mubr.f32.mxu0 %v699_v33  ;;  %v679_v37 = vadd.f32 %v1068_v55, %v678_v36 }
 0x20b   : > { %1313 = vmatmul.mubr.f32.gmra.mrb[28].mxu0 %v700_v32  ;;  %v702_v38 = vmax.f32 %v684_v35, 0.0 }
 0x20c   : > { %v701_v39 = vmax.f32 %v679_v37, 0.0  ;;  %v885_v37 = vld [vmem:[%s1940_s4] sm:$0x1] }
 0x20e   : > { %1315 = vmatprep.mubr.f32.mxu0 %v701_v39 }
 0x20f   : > { %1316 = vmatmul.mubr.f32.gmra.mrb[30].mxu0 %v702_v38  ;;  %v890_v38 = vpop.permute.xlu0 %889 }
 0x2c6   : > { %v1296_v45 = vpop.f32.mrb[16].mxu0 }
 0x2c7   : > { %v796_v46 = vadd.f32 %v1296_v45, %v1069_v44  ;;  %v790_v47 = vpop.f32.mrb[17].mxu0 }
 0x2c8   : > { %v791_v48 = vadd.f32 %v1069_v44, %v790_v47 }
 0x2c9   : > { %v870_v49 = vmax.f32 %v796_v46, 0.0 }
 0x2ca   : > { %v869_v50 = vmax.f32 %v791_v48, 0.0  ;;  %v1299_v51 = vpop.f32.mrb[18].mxu0 }
 0x2cb   : > { %v806_v52 = vadd.f32 %v1299_v51, %v1069_v44  ;;  %v800_v53 = vpop.f32.mrb[19].mxu0 }
 0x2cc   : > { %v1426_v54 = vpack.c.bf16 %v870_v49, %v869_v50  ;;  %v801_v55 = vadd.f32 %v1069_v44, %v800_v53 }
 0x2cd   : > { %v872_v56 = vmax.f32 %v806_v52, 0.0 }
 0x2ce   : > { %v871_v57 = vmax.f32 %v801_v55, 0.0  ;;  %1427 = vmatpush3.bf16.xpose.msra.mxu1 %v1426_v54  ;;  %v1302_v58 = vpop.f32.mrb[20].mxu0 }
 0x2cf   : > { %v816_v59 = vadd.f32 %v1302_v58, %v1069_v44  ;;  %v810_v60 = vpop.f32.mrb[21].mxu0  ;;  %1428 = vmatprep.subr.bf16.mxu1 %v1605_v40 }
 0x2d0   : > { %v1429_v61 = vpack.c.bf16 %v872_v56, %v871_v57  ;;  %v811_v62 = vadd.f32 %v1069_v44, %v810_v60 }
 0x2d1   : > { %v874_v63 = vmax.f32 %v816_v59, 0.0 }
 0x2d2   : > { %v873_v0 = vmax.f32 %v811_v62, 0.0  ;;  %v1305_v1 = vpop.f32.mrb[22].mxu0 }
 0x2d3   : > { %v826_v2 = vadd.f32 %v1305_v1, %v1069_v44  ;;  %v820_v3 = vpop.f32.mrb[23].mxu0 }
 0x2d4   : > { %v1432_v4 = vpack.c.bf16 %v874_v63, %v873_v0  ;;  %v821_v5 = vadd.f32 %v1069_v44, %v820_v3 }
 0x2d5   : > { %v876_v6 = vmax.f32 %v826_v2, 0.0 }
 0x2d6   : > { %1430 = vmatpush3.bf16.xpose.msra.mxu1 %v1429_v61  ;;  %v875_v7 = vmax.f32 %v821_v5, 0.0  ;;  %v1308_v8 = vpop.f32.mrb[24].mxu0 }
 0x2d7   : > { %1431 = vmatprep.subr.bf16.mxu1 %v1605_v40  ;;  %v836_v9 = vadd.f32 %v1308_v8, %v1069_v44  ;;  %v830_v10 = vpop.f32.mrb[25].mxu0 }
 0x2d8   : > { %v1435_v11 = vpack.c.bf16 %v876_v6, %v875_v7  ;;  %v831_v12 = vadd.f32 %v1069_v44, %v830_v10 }
 0x2d9   : > { %v878_v13 = vmax.f32 %v836_v9, 0.0 }
 0x2da   : > { %v877_v14 = vmax.f32 %v831_v12, 0.0  ;;  %v1311_v15 = vpop.f32.mrb[26].mxu0 }
 0x2db   : > { %v846_v16 = vadd.f32 %v1311_v15, %v1069_v44  ;;  %v840_v17 = vpop.f32.mrb[27].mxu0 }
 0x2dc   : > { %v1438_v18 = vpack.c.bf16 %v878_v13, %v877_v14  ;;  %v841_v19 = vadd.f32 %v1069_v44, %v840_v17 }
 0x2dd   : > { %v880_v20 = vmax.f32 %v846_v16, 0.0 }
 0x2de   : > { %1433 = vmatpush3.bf16.xpose.msra.mxu1 %v1432_v4  ;;  %v879_v21 = vmax.f32 %v841_v19, 0.0  ;;  %v1314_v22 = vpop.f32.mrb[28].mxu0 }
 0x2df   : > { %1434 = vmatprep.subr.bf16.mxu1 %v1605_v40  ;;  %v856_v23 = vadd.f32 %v1314_v22, %v1069_v44  ;;  %v850_v24 = vpop.f32.mrb[29].mxu0 }
 0x2e0   : > { %v1441_v25 = vpack.c.bf16 %v880_v20, %v879_v21  ;;  %v851_v26 = vadd.f32 %v1069_v44, %v850_v24 }
 0x2e1   : > { %v882_v27 = vmax.f32 %v856_v23, 0.0 }
 0x2e2   : > { %v881_v28 = vmax.f32 %v851_v26, 0.0  ;;  %v1317_v29 = vpop.f32.mrb[30].mxu0 }
 0x2e3   : > { %v866_v30 = vadd.f32 %v1317_v29, %v1069_v44  ;;  %v860_v31 = vpop.f32.mrb[31].mxu0 }
 0x2e4   : > { %v1444_v32 = vpack.c.bf16 %v882_v27, %v881_v28  ;;  %v861_v33 = vadd.f32 %v1069_v44, %v860_v31 }
 0x2e5   : > { %v884_v34 = vmax.f32 %v866_v30, 0.0 }
 0x2e6   : > { %1436 = vmatpush3.bf16.xpose.msra.mxu1 %v1435_v11  ;;  %v883_v35 = vmax.f32 %v861_v33, 0.0 }
 0x2e7   : > { %1437 = vmatprep.subr.bf16.mxu1 %v1605_v40 }
 0x2e8   : > { %v1447_v36 = vpack.c.bf16 %v884_v34, %v883_v35 }
 0x2ee   : > { %1439 = vmatpush3.bf16.xpose.msra.mxu1 %v1438_v18 }
 0x2ef   : > { %1440 = vmatprep.subr.bf16.mxu1 %v1605_v40 }
 0x2f6   : > { %1442 = vmatpush3.bf16.xpose.msra.mxu1 %v1441_v25 }
 0x2f7   : > { %1443 = vmatprep.subr.bf16.mxu1 %v1605_v40 }
 0x2fe   : > { %1445 = vmatpush3.bf16.xpose.msra.mxu1 %v1444_v32 }
 0x2ff   : > { %1446 = vmatprep.subr.bf16.mxu1 %v1605_v40 }
 0x306   : > { %1448 = vmatpush3.bf16.xpose.msra.mxu1 %v1447_v36 }
 0x30d   : > { %1351 = vmatmul.mubr.f32.vlgmr.msra.gmra.mrb[16].mxu1 %v885_v37 }
 0x3e0   : > { %v958_v39 = vpop.f32.mrb[16].mxu1 }
 0x3e1   : > { %v959_v41 = vadd.f32 %v958_v39, %v890_v38  ;;  %v1352_v42 = vpop.f32.mrb[17].mxu1 }
 0x3e3   : > { %962 = vst [vmem:[%s271_s17] sm:$0x1] %v959_v41 }
 0x3e4   : > { %1547 = shalt.err (!%p1544_p7)
}
 0x3e5   : > { %s1548_s13 = scalar_lea.hbm %s1894_s26, 16  ;;  %s1552_s16 = scalar_lea.hbm %s1942_s6, 32 }
 0x3e6   : > { %p1549_p8 = scmp.ne.s32.totalorder %s1894_s26, %s1548_s13  ;;  %p1553_p1 = scmp.lt.u32.totalorder %s1894_s26, %s1942_s6 }
 0x3e7   : > { %p1554_p0 = scmp.lt.u32.totalorder %s1552_s16, %s1548_s13  ;;  %p1556_p6 = scmp.lt.u32.totalorder %s1548_s13, %s1894_s26 }
 0x3e8   : > { %p1550_p11 = pnand %p1549_p8, %p1953_p9 }
 0x3e9   : > { %p1555_p5 = por %p1554_p0, %p1553_p1 }
 0x3ea   : > { %p1551_p13 = pneg %p1550_p11 }
 0x3eb   : > { %p1557_p10 = por %p1556_p6, %p1555_p5 }
 0x3ed   : > { %p1558_p12 = pnand %p1557_p10, %p1551_p13 }
 0x3ef   : > { %1561 = shalt.err (!%p1558_p12)
}
 0x3f0   : > { %1453 = dma.vmem_to_hbm [thread:$0]  (%p1953_p9), %s1896_s18, 16, %s1894_s26, %s964_s28  }
 0x3f1 PF: > { %p1465_p2 = scmp.ge.s32.totalorder %s1600_s24, 2  ;;  %s988_s17 = sand.u32 1, %s1588_s21  }
 0x3f2   : > { %p1954_p3 = scmp.ne.s32.totalorder %s1947_s8, 0  ;;  %s989_s19 = scalar_lea.sflag [#allocation4], %s988_s17 }
 0x3f4   : > { %p1460_p4 = pnand %p1465_p2, %p1954_p3 }
 0x3f6   : > { %1583 = dma.done.wait (!%p1460_p4), %s989_s19, 16  }
 0x3f7   : > { %1585 = vsyncadd (!%p1460_p4), %s989_s19, 4294967280  ;;  %p17_p7 = scmp.ge.s32.totalorder %s1670_s27, 4   ;;  %s1955_s21 = smov %s1592_s22 }
 0x3f8   : > { %s1956_s22 = smov %s1596_s23  ;;  %s1957_s23 = smov %s1681_s30 }
 0x3f9   : > { %s1958_s24 = smov %s1670_s27  ;;  %19 = sbr.rel (!%p17_p7) target bundleno = 4 (0x4), region = 84 }
 0x400   :  { %993 = vsyncpa [#allocation3], 1 }
 0x401   :  { %995 = vsyncpa [#allocation3 + $0x1], 1 }
 0x402   :  { %996 = vsyncpa [#allocation4], 1 }
 0x403   :  { %998 = vsyncpa [#allocation4 + $0x1], 1 }

</bundles_post_ra>
